<compile_context>
chip_gen: v5e
topology: v5e:2x2
jax: 0.10.0
libtpu: 0.0.40
codegen_flags: <defaults>
</compile_context>

<pallas_src>
import jax
import jax.numpy as jnp
from jax import lax
from jax.experimental import pallas as pl
from jax.experimental.pallas import tpu as pltpu

_LANE = 128
_OUT_ROWS = 8     # transposed final-layer output block rows (row 0 is real)


def _round_up(x, m):
    return ((x + m - 1) // m) * m


def _pad2d(a, rows, cols):
    return jnp.pad(a, ((0, rows - a.shape[0]), (0, cols - a.shape[1])))


def _choose_tiling(batch):
    """tile_m / padded M.  >=2 grid steps once batch >= 32 (v7x dual-TC),
    128-aligned tiles capped at 512 for large batches, minimal M padding."""
    if batch < 32:
        m = _round_up(batch, 16)          # single tiny tile; overhead-bound
        return m, m
    if batch < 256:
        tile_m = _round_up(pl.cdiv(batch, 2), 16)
    else:
        tile_m = min(512, _round_up(pl.cdiv(batch, 2), 128))
    m_pad = _round_up(batch, tile_m)
    return tile_m, m_pad


# ----------------------------------------------------------------------------
# Fused kernel: (Linear+foldedBN+ReLU) * num_hidden  [+ final Linear], one call
# ----------------------------------------------------------------------------
def _make_fused_mlp_kernel(num_hidden, has_out):
    def kernel(*refs):
        x_ref = refs[0]
        o_ref = refs[-1]
        p = refs[1:-1]                       # alternating (w_bf16, b_f32)

        h = x_ref[...]                       # bf16 (tile_m, K0) — MXU-native
        y = None
        idx = 0
        for _ in range(num_hidden):
            w = p[idx][...]                  # bf16 (K, N_pad)
            b = p[idx + 1][...]              # f32  (1, N_pad)
            idx += 2
            y = jnp.dot(h, w, preferred_element_type=jnp.float32)   # MXU
            y = jnp.maximum(y + b, 0.0)      # folded-BN bias + ReLU (f32 VPU)
            h = y.astype(jnp.bfloat16)
        if has_out:
            w_t = p[idx][...]                # bf16 (8, K_pad): row 0 = w_out^T
            b0 = p[idx + 1][...]             # f32  (1, 1)
            # Transposed final layer: (8,K) . (tile_m,K)^T -> (8, tile_m):
            # lane-dense store, ~16x fewer output bytes than (tile_m,128) f32.
            yt = lax.dot_general(w_t, h, (((1,), (1,)), ((), ())),
                                 preferred_element_type=jnp.float32)
            o_ref[...] = yt + b0
        else:
            o_ref[...] = y                   # (tile_m, N_pad) f32

    return kernel


# ----------------------------------------------------------------------------
# Wrapper: single pallas_call over a batch grid; weights resident in VMEM
# ----------------------------------------------------------------------------
def fused_mlp(x, layer_params, out_params):
    batch, in_dim = x.shape
    if not layer_params and out_params is None:
        return x                             # degenerate: identity MLP

    tile_m, m_pad = _choose_tiling(batch)
    x_in = x.astype(jnp.bfloat16)            # halve the streamed-input bytes
    if m_pad != batch:
        x_in = jnp.pad(x_in, ((0, m_pad - batch), (0, 0)))

    flat = [x_in]
    # x last dim = full array dim (no 128 padding in HBM) -> legal BlockSpec.
    in_specs = [pl.BlockSpec((tile_m, in_dim), lambda i: (i, 0))]
    all_layers = list(layer_params) + ([out_params] if out_params is not None else [])
    for prm in all_layers:
        w, b = prm["w"], prm["b"]
        flat += [w, b]
        in_specs += [
            pl.BlockSpec(w.shape, lambda i: (0, 0)),   # VMEM-resident weights
            pl.BlockSpec(b.shape, lambda i: (0, 0)),
        ]
        # NOTE: if embed_dims grow to thousands, single-buffer these resident
        # specs (pipeline_mode=pl.Buffered(1)) or pipeline K as a grid axis.

    has_out = out_params is not None
    kernel = _make_fused_mlp_kernel(len(layer_params), has_out)

    if has_out:
        out_shape = jax.ShapeDtypeStruct((_OUT_ROWS, m_pad), jnp.float32)
        out_spec = pl.BlockSpec((_OUT_ROWS, tile_m), lambda i: (0, i))
    else:
        n_pad = layer_params[-1]["w"].shape[1]
        out_shape = jax.ShapeDtypeStruct((m_pad, n_pad), jnp.float32)
        out_spec = pl.BlockSpec((tile_m, n_pad), lambda i: (i, 0))

    return pl.pallas_call(
        kernel,
        out_shape=out_shape,
        grid=(m_pad // tile_m,),
        in_specs=in_specs,
        out_specs=out_spec,
        compiler_params=pltpu.CompilerParams(
            dimension_semantics=("parallel",),        # megacore / v7x dual-TC
            vmem_limit_bytes=32 * 1024 * 1024,
        ),
    )(*flat)


@jax.jit
def mlp_forward(x, layer_params, out_params):
    return fused_mlp(x, layer_params, out_params)


# ----------------------------------------------------------------------------
# Parameter construction: mirrors the module's __init__.  Kernel params have
# BN (eval) folded into the Linear, feature dims padded to 128 lanes (except
# the first-layer K, which stays at in_dim so x streams unpadded), W in bf16.
# Raw f32 params are kept separately for the reference check.
# ----------------------------------------------------------------------------
def init_mlp_params(key, input_dim, embed_dims, output_layer, eps=1e-5):
    k_layers, ref_layers = [], []
    in_dim = input_dim
    in_pad = input_dim                       # first-layer K left unpadded
    for embed_dim in embed_dims:
        key, kw, kb, kg, kbe, km, kv = jax.random.split(key, 7)
        bound = 1.0 / (in_dim ** 0.5)
        # nn.Linear(in_dim, embed_dim), stored transposed as (in, out)
        w = jax.random.uniform(kw, (in_dim, embed_dim), jnp.float32, -bound, bound)
        b = jax.random.uniform(kb, (1, embed_dim), jnp.float32, -bound, bound)
        # nn.BatchNorm1d(embed_dim) eval-mode parameters / running stats
        gamma = 1.0 + 0.1 * jax.random.normal(kg, (1, embed_dim), jnp.float32)
        beta = 0.1 * jax.random.normal(kbe, (1, embed_dim), jnp.float32)
        mean = 0.1 * jax.random.normal(km, (1, embed_dim), jnp.float32)
        var = 1.0 + 0.1 * jax.random.uniform(kv, (1, embed_dim), jnp.float32)
        ref_layers.append(dict(w=w, b=b, gamma=gamma, beta=beta, mean=mean, var=var))

        scale = gamma / jnp.sqrt(var + eps)
        shift = beta - mean * scale
        w_f = w * scale                      # fold BN into the Linear
        b_f = b * scale + shift
        out_pad = _round_up(embed_dim, _LANE)
        k_layers.append(dict(
            w=_pad2d(w_f, in_pad, out_pad).astype(jnp.bfloat16),
            b=_pad2d(b_f, 1, out_pad)))
        in_dim, in_pad = embed_dim, out_pad

    k_out, ref_out = None, None
    out_dim = in_dim
    if output_layer:
        key, kw, kb = jax.random.split(key, 3)
        bound = 1.0 / (in_dim ** 0.5)
        w = jax.random.uniform(kw, (in_dim, 1), jnp.float32, -bound, bound)
        b = jax.random.uniform(kb, (1, 1), jnp.float32, -bound, bound)
        ref_out = dict(w=w, b=b)
        # stored transposed + sublane-padded: (8, K_pad), row 0 = w^T
        k_out = dict(w=_pad2d(w.T, _OUT_ROWS, in_pad).astype(jnp.bfloat16), b=b)
        out_dim = 1
    return k_layers, k_out, (ref_layers, ref_out), out_dim


# ----------------------------------------------------------------------------
# Pure-JAX f32 reference: unfolded Linear -> BatchNorm1d(eval) -> ReLU
# (Dropout = identity in eval), optional final Linear.  Unpadded, f32 weights,
# so bf16/folding error of the kernel is actually measured.
# ----------------------------------------------------------------------------
def mlp_reference(x, ref_layers, ref_out, eps=1e-5):
    h = x.astype(jnp.float32)
    for p in ref_layers:
        y = h @ p["w"] + p["b"]
        y = p["gamma"] * (y - p["mean"]) / jnp.sqrt(p["var"] + eps) + p["beta"]
        h = jnp.maximum(y, 0.0)
    if ref_out is not None:
        h = h @ ref_out["w"] + ref_out["b"]
    return h


# ----------------------------------------------------------------------------
# Main
# ----------------------------------------------------------------------------
if __name__ == "__main__":
    key = jax.random.PRNGKey(0)
    k_x, k_p = jax.random.split(key)

    batch = 8
    input_dim = 32
    embed_dims = (64, 32)
    output_layer = True
    dropout = 0.2   # eval mode -> identity

    x = jax.random.normal(k_x, (batch, input_dim), jnp.float32)
    k_layers, k_out, ref_params, out_dim = init_mlp_params(
        k_p, input_dim, embed_dims, output_layer)

    out_pad = jax.block_until_ready(mlp_forward(x, k_layers, k_out))
    out = out_pad[0, :batch][:, None]        # (batch, 1) from transposed store

    ref = mlp_reference(x, *ref_params)
    assert out.shape == (batch, out_dim), out.shape
    max_err = float(jnp.max(jnp.abs(out - ref)))
    assert jnp.allclose(out, ref, atol=3e-2, rtol=3e-2), max_err

    print("KERNEL_OK")
</pallas_src>

<mosaic_0001>
module attributes {stable_mosaic.version = 11 : i64} {
  func.func @kernel(%arg0: i32, %arg1: memref<16x32xbf16, #tpu.memory_space<vmem>>, %arg2: memref<32x128xbf16, #tpu.memory_space<vmem>>, %arg3: memref<1x128xf32, #tpu.memory_space<vmem>>, %arg4: memref<128x128xbf16, #tpu.memory_space<vmem>>, %arg5: memref<1x128xf32, #tpu.memory_space<vmem>>, %arg6: memref<8x128xbf16, #tpu.memory_space<vmem>>, %arg7: memref<1x1xf32, #tpu.memory_space<vmem>>, %arg8: memref<8x16xf32, #tpu.memory_space<vmem>>) attributes {dimension_semantics = [#tpu.dimension_semantics<parallel>], iteration_bounds = array<i64: 1>, scalar_prefetch = 0 : i64, scratch_operands = 0 : i64, tpu.core_type = #tpu.core_type<tc>, window_params = [{transform_indices = @transform_0, window_bounds = array<i64: 16, 32>}, {pipeline_mode = #tpu.pipeline_mode<synchronous>, transform_indices = @transform_1, window_bounds = array<i64: 32, 128>}, {pipeline_mode = #tpu.pipeline_mode<synchronous>, transform_indices = @transform_2, window_bounds = array<i64: 1, 128>}, {pipeline_mode = #tpu.pipeline_mode<synchronous>, transform_indices = @transform_3, window_bounds = array<i64: 128, 128>}, {pipeline_mode = #tpu.pipeline_mode<synchronous>, transform_indices = @transform_4, window_bounds = array<i64: 1, 128>}, {pipeline_mode = #tpu.pipeline_mode<synchronous>, transform_indices = @transform_5, window_bounds = array<i64: 8, 128>}, {pipeline_mode = #tpu.pipeline_mode<synchronous>, transform_indices = @transform_6, window_bounds = array<i64: 1, 1>}, {transform_indices = @transform_7, window_bounds = array<i64: 8, 16>}]} {
    %c0 = arith.constant 0 : index
    %c0_0 = arith.constant 0 : index
    %0 = vector.load %arg1[%c0, %c0_0] : memref<16x32xbf16, #tpu.memory_space<vmem>>, vector<16x32xbf16>
    %c0_1 = arith.constant 0 : index
    %c0_2 = arith.constant 0 : index
    %1 = vector.load %arg2[%c0_1, %c0_2] : memref<32x128xbf16, #tpu.memory_space<vmem>>, vector<32x128xbf16>
    %c0_3 = arith.constant 0 : index
    %c0_4 = arith.constant 0 : index
    %2 = vector.load %arg3[%c0_3, %c0_4] : memref<1x128xf32, #tpu.memory_space<vmem>>, vector<1x128xf32>
    %cst = arith.constant dense<0.000000e+00> : vector<16x128xf32>
    %3 = tpu.matmul %0, %1, %cst {dimension_numbers = #tpu.dot_dimension_numbers<[1], [0], [0], [1], [0, 0, 1, 1], [], []>} : vector<16x32xbf16>, vector<32x128xbf16>, vector<16x128xf32> -> vector<16x128xf32>
    %4 = vector.broadcast %2 : vector<1x128xf32> to vector<16x128xf32>
    %5 = arith.addf %3, %4 : vector<16x128xf32>
    %cst_5 = arith.constant 0.000000e+00 : f32
    %6 = vector.broadcast %cst_5 : f32 to vector<16x128xf32>
    %7 = arith.maximumf %5, %6 : vector<16x128xf32>
    %8 = arith.truncf %7 : vector<16x128xf32> to vector<16x128xbf16>
    %c0_6 = arith.constant 0 : index
    %c0_7 = arith.constant 0 : index
    %9 = vector.load %arg4[%c0_6, %c0_7] : memref<128x128xbf16, #tpu.memory_space<vmem>>, vector<128x128xbf16>
    %c0_8 = arith.constant 0 : index
    %c0_9 = arith.constant 0 : index
    %10 = vector.load %arg5[%c0_8, %c0_9] : memref<1x128xf32, #tpu.memory_space<vmem>>, vector<1x128xf32>
    %cst_10 = arith.constant dense<0.000000e+00> : vector<16x128xf32>
    %11 = tpu.matmul %8, %9, %cst_10 {dimension_numbers = #tpu.dot_dimension_numbers<[1], [0], [0], [1], [0, 0, 1, 1], [], []>} : vector<16x128xbf16>, vector<128x128xbf16>, vector<16x128xf32> -> vector<16x128xf32>
    %12 = vector.broadcast %10 : vector<1x128xf32> to vector<16x128xf32>
    %13 = arith.addf %11, %12 : vector<16x128xf32>
    %cst_11 = arith.constant 0.000000e+00 : f32
    %14 = vector.broadcast %cst_11 : f32 to vector<16x128xf32>
    %15 = arith.maximumf %13, %14 : vector<16x128xf32>
    %16 = arith.truncf %15 : vector<16x128xf32> to vector<16x128xbf16>
    %c0_12 = arith.constant 0 : index
    %c0_13 = arith.constant 0 : index
    %17 = vector.load %arg6[%c0_12, %c0_13] : memref<8x128xbf16, #tpu.memory_space<vmem>>, vector<8x128xbf16>
    %c0_14 = arith.constant 0 : index
    %c0_15 = arith.constant 0 : index
    %18 = vector.load %arg7[%c0_14, %c0_15] : memref<1x1xf32, #tpu.memory_space<vmem>>, vector<1x1xf32>
    %cst_16 = arith.constant dense<0.000000e+00> : vector<8x16xf32>
    %19 = tpu.matmul %17, %16, %cst_16 {dimension_numbers = #tpu.dot_dimension_numbers<[1], [1], [0], [0], [0, 0, 1, 0], [], []>} : vector<8x128xbf16>, vector<16x128xbf16>, vector<8x16xf32> -> vector<8x16xf32>
    %20 = vector.broadcast %18 : vector<1x1xf32> to vector<8x16xf32>
    %21 = arith.addf %19, %20 : vector<8x16xf32>
    %c0_17 = arith.constant 0 : index
    %c0_18 = arith.constant 0 : index
    %22 = vector.load %arg8[%c0_17, %c0_18] : memref<8x16xf32, #tpu.memory_space<vmem>>, vector<8x16xf32>
    tpu.vector_store %arg8[%c0_17, %c0_18], %21 {strides = array<i32>} : memref<8x16xf32, #tpu.memory_space<vmem>>, vector<8x16xf32>,
    return
  }
  func.func @transform_0(%arg0: i32) -> (i32, i32) {
    %c0_i32 = arith.constant 0 : i32
    %c0_i32_0 = arith.constant 0 : i32
    return %arg0, %c0_i32 : i32, i32
  }
  func.func @transform_1(%arg0: i32) -> (i32, i32) {
    %c0_i32 = arith.constant 0 : i32
    %c0_i32_0 = arith.constant 0 : i32
    %c0_i32_1 = arith.constant 0 : i32
    return %c0_i32, %c0_i32_0 : i32, i32
  }
  func.func @transform_2(%arg0: i32) -> (i32, i32) {
    %c0_i32 = arith.constant 0 : i32
    %c0_i32_0 = arith.constant 0 : i32
    %c0_i32_1 = arith.constant 0 : i32
    return %c0_i32, %c0_i32_0 : i32, i32
  }
  func.func @transform_3(%arg0: i32) -> (i32, i32) {
    %c0_i32 = arith.constant 0 : i32
    %c0_i32_0 = arith.constant 0 : i32
    %c0_i32_1 = arith.constant 0 : i32
    return %c0_i32, %c0_i32_0 : i32, i32
  }
  func.func @transform_4(%arg0: i32) -> (i32, i32) {
    %c0_i32 = arith.constant 0 : i32
    %c0_i32_0 = arith.constant 0 : i32
    %c0_i32_1 = arith.constant 0 : i32
    return %c0_i32, %c0_i32_0 : i32, i32
  }
  func.func @transform_5(%arg0: i32) -> (i32, i32) {
    %c0_i32 = arith.constant 0 : i32
    %c0_i32_0 = arith.constant 0 : i32
    %c0_i32_1 = arith.constant 0 : i32
    return %c0_i32, %c0_i32_0 : i32, i32
  }
  func.func @transform_6(%arg0: i32) -> (i32, i32) {
    %c0_i32 = arith.constant 0 : i32
    %c0_i32_0 = arith.constant 0 : i32
    %c0_i32_1 = arith.constant 0 : i32
    return %c0_i32, %c0_i32_0 : i32, i32
  }
  func.func @transform_7(%arg0: i32) -> (i32, i32) {
    %c0_i32 = arith.constant 0 : i32
    %c0_i32_0 = arith.constant 0 : i32
    return %c0_i32, %arg0 : i32, i32
  }
}

</mosaic_0001>

<bundles_post_ra>
// kernel: mlp_forward.1
= control target key start
LH: loop header
LB: loop body
LE: loop exit
PB: predicated region body
PF: predicated region fallthrough
CT: control target
= control target key end

     0   :  { %s408_s0 = inlined_call_operand.vmem [shape: bf16[16,32], index: 0, kind: input, shape index: {}]   ;;  %s409_s1 = inlined_call_operand.vmem [shape: bf16[32,128], index: 1, kind: input, shape index: {}]   ;;  %s410_s2 = inlined_call_operand.vmem [shape: f32[1,128], index: 2, kind: input, shape index: {}]   ;;  %s411_s3 = inlined_call_operand.hbm [shape: bf16[128,128], index: 3, kind: input, shape index: {}]   ;;  %s412_s4 = inlined_call_operand.vmem [shape: f32[1,128], index: 4, kind: input, shape index: {}]   ;;  %s413_s5 = inlined_call_operand.vmem [shape: bf16[8,128], index: 5, kind: input, shape index: {}]   ;;  %s414_s6 = inlined_call_operand.<no memory space> [shape: f32[1,1], index: 6, kind: input, shape index: {}]   ;;  %s415_s7 = inlined_call_operand.hbm [shape: f32[8,16], index: 7, kind: output, shape index: {}]  }
   0x1   :  { %v12_v0 = vstv %s414_s6 }
   0x2   :  { %13 = vst [vmem:[#allocation2] sm:$0x1] %v12_v0 }
   0x3   :  { %14 = vsyncpa [#allocation4], 0 }
   0x4   :  { %15 = vsyncpa [#allocation5], 0  ;;  %s26_s28 = sshll.u32 %s411_s3, 4  ;;  %s336_s29 = smov [#allocation3]   ;;  %s27_s28 = int_to_ptr.hbm [resolvable:$true] %s26_s28 }
   0x5   :  { %s28_s30 = sshll.u32 %s336_s29, 4  ;;  %s337_s8 = smov 64   ;;  %s29_s30 = int_to_ptr.vmem [resolvable:$true] %s28_s30 }
   0x6   :  { %s338_s9 = smov 4  }
   0x7   :  { %34 = dma.hbm_to_vmem [thread:$0]  %s27_s28, 1024, %s29_s30, [#allocation4], %s337_s8, %s337_s8, %s338_s9  }
   0x8   :  { %332 = dma.done.wait [#allocation4], 1024  }
   0x9   :  { %333 = vsyncadd [#allocation4], 4294966272  ;;  %v266_v1 = vld [vmem:[%s409_s1 + $0x8] sm:$0xff]  ;;  %v274_v2 = vld [vmem:[#allocation3 + $0x38] sm:$0xff]  ;;  %vm73_vm0 = vcmask 261120   ;;  %v339_v21 = vmov 0  }
   0xa   :  { %83 = vmatpush.bf16.msra.mxu0 %v266_v1  ;;  %v265_v3 = vld [vmem:[%s409_s1] sm:$0xff]  ;;  %162 = vmatpush.bf16.msra.mxu1 %v274_v2  ;;  %v273_v4 = vld [vmem:[#allocation3 + $0x30] sm:$0xff]  ;;  %v272_v6 = vld [vmem:[#allocation3 + $0x28] sm:$0xff]  ;;  %s340_s17 = smov [#allocation6]   ;;  %s209_s21 = sshll.u32 %s415_s7, 4  ;;  %vm200_vm1 = vcmask 130048   ;;  %s210_s21 = int_to_ptr.hbm [resolvable:$true] %s209_s21 }
   0xb   :  { %v264_v5 = vld [vmem:[%s408_s0] sm:$0xff]  ;;  %v269_v9 = vld [vmem:[#allocation3 + $0x10] sm:$0xff]  ;;  %v268_v10 = vld [vmem:[#allocation3 + $0x8] sm:$0xff]  ;;  %280 = vset.pattern.permute.xlu0 %v339_v21  ;;  %s207_s18 = sshll.u32 %s340_s17, 4  ;;  %s208_s18 = int_to_ptr.vmem [resolvable:$true] %s207_s18 }
   0xc   :  { %v271_v7 = vld [vmem:[#allocation3 + $0x20] sm:$0xff]  ;;  %v270_v8 = vld [vmem:[#allocation3 + $0x18] sm:$0xff] }
   0xd   :  { %v267_v11 = vld [vmem:[#allocation3] sm:$0xff]  ;;  %v281_v13 = vld [vmem:[%s410_s2] ss:$0 sm:$0xff] }
   0xe   :  { %84 = vmatpush.bf16.msra.mxu0 %v265_v3  ;;  %163 = vmatpush.bf16.msra.mxu1 %v273_v4  ;;  %v283_v20 = vld [vmem:[#allocation2] ss:$0 sm:$0xff] }
   0xf   :  { %184 = vperm.xlu0 %280, %v283_v20   ;;  %v282_v23 = vld [vmem:[%s412_s4] ss:$0 sm:$0xff] }
  0x10   :  { %v179_v30 = vld [vmem:[%s413_s5] sm:$0xf] }
  0x11   :  { %231 = vmatmul.msk.bf16.vlgmr.msra.gmra.mxu0 %vm73_vm0, %v264_v5 }
  0x12   :  { %164 = vmatpush.bf16.msra.mxu1 %v272_v6 }
  0x16   :  { %165 = vmatpush.bf16.msra.mxu1 %v271_v7 }
  0x1a   :  { %166 = vmatpush.bf16.msra.mxu1 %v270_v8 }
  0x1e   :  { %167 = vmatpush.bf16.msra.mxu1 %v269_v9 }
  0x22   :  { %168 = vmatpush.bf16.msra.mxu1 %v268_v10 }
  0x26   :  { %169 = vmatpush.bf16.msra.mxu1 %v267_v11 }
  0x81   :  { %v185_v31 = vpop.permute.xlu0 %184 }
  0x8e   :  { %v86_v12 = vpop.f32.mrf.mxu0 }
  0x8f   :  { %v87_v14 = vadd.f32 %v281_v13, %v86_v12 }
  0x91   :  { %v91_v17 = vmax.f32 %v87_v14, 0.0 }
  0x96   :  { %v88_v15 = vpop.f32.mrf.mxu0 }
  0x97   :  { %v89_v16 = vadd.f32 %v281_v13, %v88_v15 }
  0x99   :  { %v92_v18 = vmax.f32 %v89_v16, 0.0 }
  0x9b   :  { %v93_v19 = vpack.c.bf16 %v92_v18, %v91_v17 }
  0x9d   :  { %170 = vmatmul.bf16.vlgmr.msra.gmra.mxu1 %v93_v19 }
 0x11a   :  { %v171_v22 = vpop.f32.mrf.mxu1 }
 0x11b   :  { %v172_v24 = vadd.f32 %v282_v23, %v171_v22 }
 0x11d   :  { %v176_v27 = vmax.f32 %v172_v24, 0.0 }
 0x122   :  { %v173_v25 = vpop.f32.mrf.mxu1 }
 0x123   :  { %v174_v26 = vadd.f32 %v282_v23, %v173_v25 }
 0x125   :  { %v177_v28 = vmax.f32 %v174_v26, 0.0 }
 0x127   :  { %v178_v29 = vpack.c.bf16 %v177_v28, %v176_v27 }
 0x129   :  { %194 = vmatpush.bf16.xpose.msra.mxu2 %v178_v29 }
 0x130   :  { %195 = vmatmul.bf16.vlgmr.msra.gmra.mxu2 %v179_v30 }
 0x1b3   :  { %v196_v32 = vpop.f32.mrf.mxu2 }
 0x1b4   :  { %v197_v33 = vadd.f32 %v196_v32, %v185_v31 }
 0x1b6   :  { %201 = vst.msk [vmem:[#allocation6] sm:$0xff] %vm200_vm1, %v197_v33 }
 0x1b7   :  { %212 = dma.vmem_to_hbm [thread:$0]  %s208_s18, 128, %s210_s21, [#allocation5]  }
 0x1bb   :  { %v198_v34 = vpop.f32.mrf.mxu2 }
 0x1bc   :  { %334 = dma.done.wait [#allocation5], 128  }
 0x1bd   :  { %335 = vsyncadd [#allocation5], 4294967168 }
 0x1be   :  { %217 = vsyncpa [#allocation4], 1 }
 0x1bf   :  { %218 = vsyncpa [#allocation5], 1 }

</bundles_post_ra>
